<compile_context>
chip_gen: v7x
topology: tpu7x:2x2x1
jax: 0.10.0
libtpu: 0.0.40
codegen_flags: <defaults>
</compile_context>

<pallas_src>
import math
import functools

import jax
import jax.numpy as jnp
from jax.experimental import pallas as pl
from jax.experimental.pallas import tpu as pltpu


def _flash_attn_kernel(*refs, scale, has_mask):
    """One (head-group, q-tile, kv-tile) step of flash attention.

    refs = (q, k, v, [mask], out, m_scratch, l_scratch, acc_scratch)
      q        : (G, tq, D)
      k, v     : (G, tk, D)
      mask     : (1 or G, tq, tk)   (only if has_mask)
      out      : (G, tq, D)
      m, l     : (G, tq, 1)  f32 scratch
      acc      : (G, tq, D)  f32 scratch
    """
    if has_mask:
        q_ref, k_ref, v_ref, mask_ref, o_ref, m_sc, l_sc, acc_sc = refs
    else:
        q_ref, k_ref, v_ref, o_ref, m_sc, l_sc, acc_sc = refs
        mask_ref = None

    ki = pl.program_id(2)

    @pl.when(ki == 0)
    def _init():
        m_sc[...] = jnp.full_like(m_sc, -jnp.inf)
        l_sc[...] = jnp.zeros_like(l_sc)
        acc_sc[...] = jnp.zeros_like(acc_sc)

    # Fold 1/sqrt(D) into q: G*tq*D multiplies instead of G*tq*tk on scores.
    q = q_ref[...] * scale
    k = k_ref[...]
    v = v_ref[...]

    # scores = (q * scale) @ k^T  -- contraction over D of both operands,
    # so no explicit transpose of the K tile is materialized.
    s = jnp.einsum("gqd,gkd->gqk", q, k, preferred_element_type=jnp.float32)
    if mask_ref is not None:
        # Matches PyTorch: x += mask.type_as(x) * (-10000.0)
        s = s + mask_ref[...].astype(jnp.float32) * jnp.float32(-10000.0)

    # online (flash) softmax update
    m_prev = m_sc[...]
    m_new = jnp.maximum(m_prev, jnp.max(s, axis=-1, keepdims=True))
    alpha = jnp.exp(m_prev - m_new)
    p = jnp.exp(s - m_new)
    l_sc[...] = alpha * l_sc[...] + jnp.sum(p, axis=-1, keepdims=True)
    acc_sc[...] = alpha * acc_sc[...] + jnp.einsum(
        "gqk,gkd->gqd", p.astype(v.dtype), v, preferred_element_type=jnp.float32
    )
    m_sc[...] = m_new

    # TODO(synk): nn.Dropout(0.1) is identity in eval mode; training-mode
    # dropout would use pltpu.prng_seed + pltpu.stateful_bernoulli on `p`.

    @pl.when(ki == pl.num_programs(2) - 1)
    def _finalize():
        l = l_sc[...]
        r = pl.reciprocal(l, approx=True)   # EUP vrcp (otherwise-idle slot)
        r = r * (2.0 - l * r)               # one Newton step -> ~exact 1/l
        o_ref[...] = (acc_sc[...] * r).astype(o_ref.dtype)


def _pick_tile(n, candidates):
    for t in candidates:
        if n % t == 0:
            return t
    return n  # full extent (always a legal block size)


def _pick_head_group(bh, d):
    """Group heads per grid step so the matmul batch is lane-dense-ish."""
    target = max(1, -(-128 // d))  # heads needed so G*D >= 128
    divisors = [g for g in range(1, bh + 1) if bh % g == 0]
    for g in divisors:
        if target <= g <= 8:
            return g
    small = [g for g in divisors if g <= 8]
    return max(small) if small else 1


def base_attention(q, k, v, mask=None):
    """Pallas BaseAttention.

    q, k, v: [..., S, D] (matching leading batch/head dims).
    mask:    broadcastable to [..., S, Sk] (nonzero = masked-out) or None.
    Returns: same shape/dtype as q.
    """
    orig_shape = q.shape
    S, D = q.shape[-2], q.shape[-1]
    Sk = k.shape[-2]
    lead = orig_shape[:-2]
    BH = 1
    for d in lead:
        BH *= d

    q3 = q.reshape(BH, S, D)
    k3 = k.reshape(BH, Sk, D)
    v3 = v.reshape(BH, Sk, D)

    scale = 1.0 / math.sqrt(D)
    has_mask = mask is not None

    G = _pick_head_group(BH, D)
    tq = _pick_tile(S, (256, 128, 64, 32, 16, 8))
    # The mask block's minor dim is tk, so with a mask tk must be a multiple
    # of 128 (or the full Sk).
    tk_cands = (512, 256, 128) if has_mask else (512, 256, 128, 64, 32, 16, 8)
    tk = _pick_tile(Sk, tk_cands)

    grid = (BH // G, S // tq, Sk // tk)

    q_spec = pl.BlockSpec((G, tq, D), lambda b, qi, ki: (b, qi, 0))
    kv_spec = pl.BlockSpec((G, tk, D), lambda b, qi, ki: (b, ki, 0))
    o_spec = pl.BlockSpec((G, tq, D), lambda b, qi, ki: (b, qi, 0))

    in_specs = [q_spec, kv_spec, kv_spec]
    operands = [q3, k3, v3]

    if has_mask:
        # Bring mask to q's rank; if it is shared across batch*heads, keep a
        # single (1, S, Sk) copy whose leading block index is pinned to 0
        # (no (BH, S, Sk) broadcast materialized in HBM).
        m = jnp.reshape(mask, (1,) * (q.ndim - jnp.ndim(mask)) + jnp.shape(mask))
        m = jnp.broadcast_to(m, m.shape[:-2] + (S, Sk))
        shared = all(d == 1 for d in m.shape[:-2])
        if shared:
            m3 = m.reshape(1, S, Sk).astype(jnp.float32)
            mask_spec = pl.BlockSpec((1, tq, tk), lambda b, qi, ki: (0, qi, ki))
        else:
            m3 = (
                jnp.broadcast_to(m, lead + (S, Sk))
                .reshape(BH, S, Sk)
                .astype(jnp.float32)
            )
            mask_spec = pl.BlockSpec((G, tq, tk), lambda b, qi, ki: (b, qi, ki))
        in_specs.append(mask_spec)
        operands.append(m3)

    kernel = functools.partial(_flash_attn_kernel, scale=scale, has_mask=has_mask)

    out = pl.pallas_call(
        kernel,
        out_shape=jax.ShapeDtypeStruct((BH, S, D), q.dtype),
        grid=grid,
        in_specs=in_specs,
        out_specs=o_spec,
        scratch_shapes=[
            pltpu.VMEM((G, tq, 1), jnp.float32),  # running max
            pltpu.VMEM((G, tq, 1), jnp.float32),  # running denominator
            pltpu.VMEM((G, tq, D), jnp.float32),  # output accumulator
        ],
        compiler_params=pltpu.CompilerParams(
            dimension_semantics=("parallel", "parallel", "arbitrary"),
            vmem_limit_bytes=32 * 1024 * 1024,  # raise v5e's 16 MiB default
        ),
    )(*operands)

    return out.reshape(orig_shape)


def _reference(q, k, v, mask=None):
    d = k.shape[-1]
    x = jnp.matmul(q, jnp.swapaxes(k, -2, -1)) / math.sqrt(d)
    if mask is not None:
        x = x + mask.astype(x.dtype) * (-10000.0)
    x = jax.nn.softmax(x, axis=-1)
    return jnp.matmul(x, v)


if __name__ == "__main__":
    key = jax.random.PRNGKey(0)
    kq, kk, kv = jax.random.split(key, 3)

    # Small shapes consistent with the module.
    B, H, S, D = 2, 2, 8, 32
    q = jax.random.normal(kq, (B, H, S, D), dtype=jnp.float32)
    k = jax.random.normal(kk, (B, H, S, D), dtype=jnp.float32)
    v = jax.random.normal(kv, (B, H, S, D), dtype=jnp.float32)

    # causal mask: 1.0 where attention is disallowed (upper triangle)
    causal = jnp.triu(jnp.ones((S, S), dtype=jnp.float32), k=1)
    mask = causal[None, None, :, :]  # broadcastable to (B, H, S, S)

    out = jax.block_until_ready(base_attention(q, k, v, mask))
    ref = _reference(q, k, v, mask)
    assert out.shape == (B, H, S, D)
    assert jnp.allclose(out, ref, atol=1e-4, rtol=1e-4), "mismatch vs reference (masked)"

    # mask=None path
    out_nm = jax.block_until_ready(base_attention(q, k, v, None))
    ref_nm = _reference(q, k, v, None)
    assert jnp.allclose(out_nm, ref_nm, atol=1e-4, rtol=1e-4), "mismatch (no mask)"

    # Medium case exercising the multi-tile online-softmax (flash) path:
    # grid = (2, 3, 3) with tq=tk=128, G=2.
    B2, H2, S2, D2 = 1, 4, 384, 64
    kq2, kk2, kv2 = jax.random.split(jax.random.PRNGKey(1), 3)
    q2 = jax.random.normal(kq2, (B2, H2, S2, D2), dtype=jnp.float32)
    k2 = jax.random.normal(kk2, (B2, H2, S2, D2), dtype=jnp.float32)
    v2 = jax.random.normal(kv2, (B2, H2, S2, D2), dtype=jnp.float32)
    causal2 = jnp.triu(jnp.ones((S2, S2), dtype=jnp.float32), k=1)[None, None]
    out2 = jax.block_until_ready(base_attention(q2, k2, v2, causal2))
    ref2 = _reference(q2, k2, v2, causal2)
    assert jnp.allclose(out2, ref2, atol=2e-3, rtol=2e-3), "mismatch (tiled path)"

    print("KERNEL_OK")
</pallas_src>

<mosaic_0001>
module attributes {stable_mosaic.version = 11 : i64} {
  func.func @_flash_attn_kernel(%arg0: i32, %arg1: i32, %arg2: i32, %arg3: memref<4x8x32xf32, #tpu.memory_space<vmem>>, %arg4: memref<4x8x32xf32, #tpu.memory_space<vmem>>, %arg5: memref<4x8x32xf32, #tpu.memory_space<vmem>>, %arg6: memref<1x8x8xf32, #tpu.memory_space<vmem>>, %arg7: memref<4x8x32xf32, #tpu.memory_space<vmem>>, %arg8: memref<4x8x1xf32, #tpu.memory_space<vmem>>, %arg9: memref<4x8x1xf32, #tpu.memory_space<vmem>>, %arg10: memref<4x8x32xf32, #tpu.memory_space<vmem>>) attributes {dimension_semantics = [#tpu.dimension_semantics<parallel>, #tpu.dimension_semantics<parallel>, #tpu.dimension_semantics<arbitrary>], iteration_bounds = array<i64: 1, 1, 1>, scalar_prefetch = 0 : i64, scratch_operands = 3 : i64, tpu.core_type = #tpu.core_type<tc>, window_params = [{transform_indices = @transform_0, window_bounds = array<i64: 4, 8, 32>}, {transform_indices = @transform_1, window_bounds = array<i64: 4, 8, 32>}, {transform_indices = @transform_2, window_bounds = array<i64: 4, 8, 32>}, {transform_indices = @transform_3, window_bounds = array<i64: 1, 8, 8>}, {transform_indices = @transform_4, window_bounds = array<i64: 4, 8, 32>}]} {
    %c0_i32 = arith.constant 0 : i32
    %0 = arith.cmpi eq, %arg2, %c0_i32 : i32
    %1 = arith.extui %0 : i1 to i32
    %c0_i32_0 = arith.constant 0 : i32
    %2 = arith.cmpi ne, %1, %c0_i32_0 : i32
    scf.if %2 {
      %cst_37 = arith.constant 0xFF800000 : f32
      %39 = vector.broadcast %cst_37 : f32 to vector<4x8x1xf32>
      %c0_38 = arith.constant 0 : index
      %c0_39 = arith.constant 0 : index
      %c0_40 = arith.constant 0 : index
      %40 = vector.load %arg8[%c0_38, %c0_39, %c0_40] : memref<4x8x1xf32, #tpu.memory_space<vmem>>, vector<4x8x1xf32>
      tpu.vector_store %arg8[%c0_38, %c0_39, %c0_40], %39 {strides = array<i32>} : memref<4x8x1xf32, #tpu.memory_space<vmem>>, vector<4x8x1xf32>,
      %cst_41 = arith.constant 0.000000e+00 : f32
      %41 = vector.broadcast %cst_41 : f32 to vector<4x8x1xf32>
      %c0_42 = arith.constant 0 : index
      %c0_43 = arith.constant 0 : index
      %c0_44 = arith.constant 0 : index
      %42 = vector.load %arg9[%c0_42, %c0_43, %c0_44] : memref<4x8x1xf32, #tpu.memory_space<vmem>>, vector<4x8x1xf32>
      tpu.vector_store %arg9[%c0_42, %c0_43, %c0_44], %41 {strides = array<i32>} : memref<4x8x1xf32, #tpu.memory_space<vmem>>, vector<4x8x1xf32>,
      %cst_45 = arith.constant 0.000000e+00 : f32
      %43 = vector.broadcast %cst_45 : f32 to vector<4x8x32xf32>
      %c0_46 = arith.constant 0 : index
      %c0_47 = arith.constant 0 : index
      %c0_48 = arith.constant 0 : index
      %44 = vector.load %arg10[%c0_46, %c0_47, %c0_48] : memref<4x8x32xf32, #tpu.memory_space<vmem>>, vector<4x8x32xf32>
      tpu.vector_store %arg10[%c0_46, %c0_47, %c0_48], %43 {strides = array<i32>} : memref<4x8x32xf32, #tpu.memory_space<vmem>>, vector<4x8x32xf32>,
    } else {
    }
    %c0 = arith.constant 0 : index
    %c0_1 = arith.constant 0 : index
    %c0_2 = arith.constant 0 : index
    %3 = vector.load %arg3[%c0, %c0_1, %c0_2] : memref<4x8x32xf32, #tpu.memory_space<vmem>>, vector<4x8x32xf32>
    %cst = arith.constant 0.176776692 : f32
    %4 = vector.broadcast %cst : f32 to vector<4x8x32xf32>
    %5 = arith.mulf %3, %4 : vector<4x8x32xf32>
    %c0_3 = arith.constant 0 : index
    %c0_4 = arith.constant 0 : index
    %c0_5 = arith.constant 0 : index
    %6 = vector.load %arg4[%c0_3, %c0_4, %c0_5] : memref<4x8x32xf32, #tpu.memory_space<vmem>>, vector<4x8x32xf32>
    %c0_6 = arith.constant 0 : index
    %c0_7 = arith.constant 0 : index
    %c0_8 = arith.constant 0 : index
    %7 = vector.load %arg5[%c0_6, %c0_7, %c0_8] : memref<4x8x32xf32, #tpu.memory_space<vmem>>, vector<4x8x32xf32>
    "tpu.trace_start"() <{level = 10 : i32, message = "gqd,gkd->gqk"}> : () -> ()
    %cst_9 = arith.constant dense<0.000000e+00> : vector<4x8x8xf32>
    %8 = tpu.matmul %5, %6, %cst_9 {dimension_numbers = #tpu.dot_dimension_numbers<[2], [2], [1], [1], [0, 0, 0, 1, 1, 1], [0], [0]>} : vector<4x8x32xf32>, vector<4x8x32xf32>, vector<4x8x8xf32> -> vector<4x8x8xf32>
    "tpu.trace_stop"() : () -> ()
    %c0_10 = arith.constant 0 : index
    %c0_11 = arith.constant 0 : index
    %c0_12 = arith.constant 0 : index
    %9 = vector.load %arg6[%c0_10, %c0_11, %c0_12] : memref<1x8x8xf32, #tpu.memory_space<vmem>>, vector<1x8x8xf32>
    %cst_13 = arith.constant -1.000000e+04 : f32
    %10 = vector.broadcast %cst_13 : f32 to vector<1x8x8xf32>
    %11 = arith.mulf %9, %10 : vector<1x8x8xf32>
    %12 = vector.broadcast %11 : vector<1x8x8xf32> to vector<4x8x8xf32>
    %13 = arith.addf %8, %12 : vector<4x8x8xf32>
    %c0_14 = arith.constant 0 : index
    %c0_15 = arith.constant 0 : index
    %c0_16 = arith.constant 0 : index
    %14 = vector.load %arg8[%c0_14, %c0_15, %c0_16] : memref<4x8x1xf32, #tpu.memory_space<vmem>>, vector<4x8x1xf32>
    %cst_17 = arith.constant dense<0xFF800000> : vector<4x8xf32>
    %15 = vector.multi_reduction <maximumf>, %13, %cst_17 [2] : vector<4x8x8xf32> to vector<4x8xf32>
    %16 = vector.shape_cast %15 : vector<4x8xf32> to vector<4x8x1xf32>
    %17 = arith.maximumf %14, %16 : vector<4x8x1xf32>
    %18 = arith.subf %14, %17 : vector<4x8x1xf32>
    %19 = math.exp %18 : vector<4x8x1xf32>
    %20 = vector.broadcast %17 : vector<4x8x1xf32> to vector<4x8x8xf32>
    %21 = arith.subf %13, %20 : vector<4x8x8xf32>
    %22 = math.exp %21 : vector<4x8x8xf32>
    %c0_18 = arith.constant 0 : index
    %c0_19 = arith.constant 0 : index
    %c0_20 = arith.constant 0 : index
    %23 = vector.load %arg9[%c0_18, %c0_19, %c0_20] : memref<4x8x1xf32, #tpu.memory_space<vmem>>, vector<4x8x1xf32>
    %24 = arith.mulf %19, %23 : vector<4x8x1xf32>
    %cst_21 = arith.constant dense<0.000000e+00> : vector<4x8xf32>
    %25 = vector.multi_reduction <add>, %22, %cst_21 [2] : vector<4x8x8xf32> to vector<4x8xf32>
    %26 = vector.shape_cast %25 : vector<4x8xf32> to vector<4x8x1xf32>
    %27 = arith.addf %24, %26 : vector<4x8x1xf32>
    %c0_22 = arith.constant 0 : index
    %c0_23 = arith.constant 0 : index
    %c0_24 = arith.constant 0 : index
    %28 = vector.load %arg9[%c0_22, %c0_23, %c0_24] : memref<4x8x1xf32, #tpu.memory_space<vmem>>, vector<4x8x1xf32>
    tpu.vector_store %arg9[%c0_22, %c0_23, %c0_24], %27 {strides = array<i32>} : memref<4x8x1xf32, #tpu.memory_space<vmem>>, vector<4x8x1xf32>,
    %c0_25 = arith.constant 0 : index
    %c0_26 = arith.constant 0 : index
    %c0_27 = arith.constant 0 : index
    %29 = vector.load %arg10[%c0_25, %c0_26, %c0_27] : memref<4x8x32xf32, #tpu.memory_space<vmem>>, vector<4x8x32xf32>
    %30 = vector.broadcast %19 : vector<4x8x1xf32> to vector<4x8x32xf32>
    %31 = arith.mulf %30, %29 : vector<4x8x32xf32>
    "tpu.trace_start"() <{level = 10 : i32, message = "gqk,gkd->gqd"}> : () -> ()
    %cst_28 = arith.constant dense<0.000000e+00> : vector<4x8x32xf32>
    %32 = tpu.matmul %22, %7, %cst_28 {dimension_numbers = #tpu.dot_dimension_numbers<[2], [1], [1], [2], [0, 0, 0, 1, 1, 2], [0], [0]>} : vector<4x8x8xf32>, vector<4x8x32xf32>, vector<4x8x32xf32> -> vector<4x8x32xf32>
    "tpu.trace_stop"() : () -> ()
    %33 = arith.addf %31, %32 : vector<4x8x32xf32>
    %c0_29 = arith.constant 0 : index
    %c0_30 = arith.constant 0 : index
    %c0_31 = arith.constant 0 : index
    %34 = vector.load %arg10[%c0_29, %c0_30, %c0_31] : memref<4x8x32xf32, #tpu.memory_space<vmem>>, vector<4x8x32xf32>
    tpu.vector_store %arg10[%c0_29, %c0_30, %c0_31], %33 {strides = array<i32>} : memref<4x8x32xf32, #tpu.memory_space<vmem>>, vector<4x8x32xf32>,
    %c0_32 = arith.constant 0 : index
    %c0_33 = arith.constant 0 : index
    %c0_34 = arith.constant 0 : index
    %35 = vector.load %arg8[%c0_32, %c0_33, %c0_34] : memref<4x8x1xf32, #tpu.memory_space<vmem>>, vector<4x8x1xf32>
    tpu.vector_store %arg8[%c0_32, %c0_33, %c0_34], %17 {strides = array<i32>} : memref<4x8x1xf32, #tpu.memory_space<vmem>>, vector<4x8x1xf32>,
    %c0_i32_35 = arith.constant 0 : i32
    %36 = arith.cmpi eq, %arg2, %c0_i32_35 : i32
    %37 = arith.extui %36 : i1 to i32
    %c0_i32_36 = arith.constant 0 : i32
    %38 = arith.cmpi ne, %37, %c0_i32_36 : i32
    scf.if %38 {
      %c0_37 = arith.constant 0 : index
      %c0_38 = arith.constant 0 : index
      %c0_39 = arith.constant 0 : index
      %39 = vector.load %arg9[%c0_37, %c0_38, %c0_39] : memref<4x8x1xf32, #tpu.memory_space<vmem>>, vector<4x8x1xf32>
      %40 = tpu.reciprocal %39 {approx = true} : vector<4x8x1xf32> -> vector<4x8x1xf32>
      %41 = arith.mulf %39, %40 : vector<4x8x1xf32>
      %cst_40 = arith.constant 2.000000e+00 : f32
      %42 = vector.broadcast %cst_40 : f32 to vector<4x8x1xf32>
      %43 = arith.subf %42, %41 : vector<4x8x1xf32>
      %44 = arith.mulf %40, %43 : vector<4x8x1xf32>
      %c0_41 = arith.constant 0 : index
      %c0_42 = arith.constant 0 : index
      %c0_43 = arith.constant 0 : index
      %45 = vector.load %arg10[%c0_41, %c0_42, %c0_43] : memref<4x8x32xf32, #tpu.memory_space<vmem>>, vector<4x8x32xf32>
      %46 = vector.broadcast %44 : vector<4x8x1xf32> to vector<4x8x32xf32>
      %47 = arith.mulf %45, %46 : vector<4x8x32xf32>
      %c0_44 = arith.constant 0 : index
      %c0_45 = arith.constant 0 : index
      %c0_46 = arith.constant 0 : index
      %48 = vector.load %arg7[%c0_44, %c0_45, %c0_46] : memref<4x8x32xf32, #tpu.memory_space<vmem>>, vector<4x8x32xf32>
      tpu.vector_store %arg7[%c0_44, %c0_45, %c0_46], %47 {strides = array<i32>} : memref<4x8x32xf32, #tpu.memory_space<vmem>>, vector<4x8x32xf32>,
    } else {
    }
    return
  }
  func.func @transform_0(%arg0: i32, %arg1: i32, %arg2: i32) -> (i32, i32, i32) {
    %c0_i32 = arith.constant 0 : i32
    %c0_i32_0 = arith.constant 0 : i32
    return %arg0, %arg1, %c0_i32 : i32, i32, i32
  }
  func.func @transform_1(%arg0: i32, %arg1: i32, %arg2: i32) -> (i32, i32, i32) {
    %c0_i32 = arith.constant 0 : i32
    %c0_i32_0 = arith.constant 0 : i32
    return %arg0, %arg2, %c0_i32 : i32, i32, i32
  }
  func.func @transform_2(%arg0: i32, %arg1: i32, %arg2: i32) -> (i32, i32, i32) {
    %c0_i32 = arith.constant 0 : i32
    %c0_i32_0 = arith.constant 0 : i32
    return %arg0, %arg2, %c0_i32 : i32, i32, i32
  }
  func.func @transform_3(%arg0: i32, %arg1: i32, %arg2: i32) -> (i32, i32, i32) {
    %c0_i32 = arith.constant 0 : i32
    %c0_i32_0 = arith.constant 0 : i32
    return %c0_i32, %arg1, %arg2 : i32, i32, i32
  }
  func.func @transform_4(%arg0: i32, %arg1: i32, %arg2: i32) -> (i32, i32, i32) {
    %c0_i32 = arith.constant 0 : i32
    %c0_i32_0 = arith.constant 0 : i32
    return %arg0, %arg1, %c0_i32 : i32, i32, i32
  }
}

</mosaic_0001>

<bundles_post_ra>
// kernel: tpu_custom_call.1
= control target key start
LH: loop header
LB: loop body
LE: loop exit
PB: predicated region body
PF: predicated region fallthrough
CT: control target
= control target key end

     0   :  { %9 = vsyncpa [#allocation6], 0  ;;  %s1298_s0 = inlined_call_operand.hbm [shape: f32[4,8,32], index: 0, kind: input, shape index: {}]   ;;  %s1299_s1 = inlined_call_operand.hbm [shape: f32[4,8,32], index: 1, kind: input, shape index: {}]   ;;  %s1300_s2 = inlined_call_operand.hbm [shape: f32[4,8,32], index: 2, kind: input, shape index: {}]   ;;  %s1301_s3 = inlined_call_operand.vmem [shape: f32[1,8,8], index: 3, kind: input, shape index: {}]   ;;  %s1302_s4 = inlined_call_operand.hbm [shape: f32[4,8,32], index: 4, kind: output, shape index: {}]  }
   0x1   :  { %10 = vsyncpa [#allocation9], 0 }
   0x2   :  { %11 = vsyncpa [#allocation7], 0  ;;  %s1097_s15 = smov [#allocation8]   ;;  %s1098_s17 = smov [#allocation5]  }
   0x3   :  { %s29_s16 = sshll.u32 %s1097_s15, 4  ;;  %s17_s18 = sshll.u32 %s1098_s17, 4  ;;  %s30_s16 = int_to_ptr.vmem [resolvable:$true] %s29_s16  ;;  %s1132_s18 = int_to_ptr.vmem [resolvable:$true] %s17_s18 }
   0x4   :  { %s1003_s21 = scalar_lea.hbm %s1299_s1, 512 }
   0x5   :  { %p1004_p0 = scmp.ne.s32.totalorder %s1299_s1, %s1003_s21  ;;  %p1007_p1 = scmp.lt.u32.totalorder %s1003_s21, %s1299_s1 }
   0x7   :  { %p1009_p2 = pnand %p1007_p1, %p1004_p0 }
   0x9   :  { %1012 = shalt.err (!%p1009_p2)
}
   0xa   :  { %s1013_s26 = scalar_lea.vmem %s30_s16, 512  ;;  %p1018_p4 = scmp.lt.s32.totalorder %s30_s16, %s30_s16 }
   0xb   :  { %p1014_p3 = scmp.ne.s32.totalorder %s30_s16, %s1013_s26  ;;  %p1019_p5 = scmp.lt.s32.totalorder %s1013_s26, %s1013_s26 }
   0xd   :  { %p1020_p6 = por %p1019_p5, %p1018_p4 }
   0xf   :  { %p1021_p7 = pnand %p1020_p6, %p1014_p3 }
  0x11   :  { %1024 = shalt.err (!%p1021_p7)
}
  0x12   :  { %s1099_s27 = smov 128   ;;  %s1100_s28 = smov 8  }
  0x13   :  { %35 = dma.hbm_to_vmem [thread:$0]  %s1299_s1, 512, %s30_s16, [#allocation9], %s1099_s27, %s1099_s27, %s1100_s28  }
  0x14   :  { %s1025_s7 = scalar_lea.hbm %s1298_s0, 512 }
  0x15   :  { %p1026_p8 = scmp.ne.s32.totalorder %s1298_s0, %s1025_s7  ;;  %p1029_p9 = scmp.lt.u32.totalorder %s1025_s7, %s1298_s0 }
  0x17   :  { %p1031_p10 = pnand %p1029_p9, %p1026_p8 }
  0x19   :  { %1034 = shalt.err (!%p1031_p10)
}
  0x1a   :  { %s1035_s12 = scalar_lea.vmem %s1132_s18, 512  ;;  %p1040_p12 = scmp.lt.s32.totalorder %s1132_s18, %s1132_s18 }
  0x1b   :  { %p1036_p11 = scmp.ne.s32.totalorder %s1132_s18, %s1035_s12  ;;  %p1041_p13 = scmp.lt.s32.totalorder %s1035_s12, %s1035_s12 }
  0x1d   :  { %p1042_p0 = por %p1041_p13, %p1040_p12 }
  0x1f   :  { %p1043_p1 = pnand %p1042_p0, %p1036_p11 }
  0x21   :  { %1046 = shalt.err (!%p1043_p1)
}
  0x22   :  { %23 = dma.hbm_to_vmem [thread:$0]  %s1298_s0, 512, %s1132_s18, [#allocation6], %s1099_s27, %s1099_s27, %s1100_s28  }
  0x23   :  { %s1101_s14 = smov [#allocation10]   ;;  %s1047_s19 = scalar_lea.hbm %s1300_s2, 512 }
  0x24   :  { %s41_s15 = sshll.u32 %s1101_s14, 4  ;;  %p1048_p2 = scmp.ne.s32.totalorder %s1300_s2, %s1047_s19  ;;  %s42_s15 = int_to_ptr.vmem [resolvable:$true] %s41_s15 }
  0x25   :  { %p1051_p3 = scmp.lt.u32.totalorder %s1047_s19, %s1300_s2 }
  0x27   :  { %p1053_p4 = pnand %p1051_p3, %p1048_p2 }
  0x29   :  { %1056 = shalt.err (!%p1053_p4)
}
  0x2a   :  { %s1057_s24 = scalar_lea.vmem %s42_s15, 512  ;;  %p1062_p6 = scmp.lt.s32.totalorder %s42_s15, %s42_s15 }
  0x2b   :  { %p1058_p5 = scmp.ne.s32.totalorder %s42_s15, %s1057_s24  ;;  %p1063_p7 = scmp.lt.s32.totalorder %s1057_s24, %s1057_s24 }
  0x2d   :  { %p1064_p8 = por %p1063_p7, %p1062_p6 }
  0x2f   :  { %p1065_p9 = pnand %p1064_p8, %p1058_p5 }
  0x31   :  { %1068 = shalt.err (!%p1065_p9)
}
  0x32   :  { %47 = dma.hbm_to_vmem [thread:$0]  %s1300_s2, 512, %s42_s15, [#allocation9], %s1099_s27, %s1099_s27, %s1100_s28  }
  0x33   :  { %1091 = dma.done.wait [#allocation6], 512  }
  0x34   :  { %1092 = vsyncadd [#allocation6], 4294966784 }
  0x35   :  { %1093 = dma.done.wait [#allocation9], 1024  }
  0x36   :  { %1094 = vsyncadd [#allocation9], 4294966272  ;;  %vm72_vm0 = vcmask 261120   ;;  %v1102_v0 = vmov 0.0   ;;  %vm1103_vm1 = vmmov 0   ;;  %v85_v1 = vld [vmem:[#allocation8] sm:$0xff] }
  0x37   :  { %927 = vmatprep.subr.mxu0 %v1102_v0  ;;  %73 = vst.msk [vmem:[#allocation4] sm:$0xff] %vm72_vm0, %v1102_v0  ;;  %74 = vst.msk [vmem:[#allocation4 + $0x8] sm:$0xff] %vm72_vm0, %v1102_v0  ;;  %929 = vmatprep.mubr.msk.f32.mxu0 %vm1103_vm1, %v1102_v0  ;;  %v77_v2 = vld [vmem:[#allocation5] sm:$0xff]  ;;  %v86_v3 = vld [vmem:[#allocation8 + $0x8] sm:$0xff]  ;;  %vm63_vm2 = vcmask 7168   ;;  %v1104_v13 = vmov -inf  }
  0x38   :  { %75 = vst.msk [vmem:[#allocation4 + $0x10] sm:$0xff] %vm72_vm0, %v1102_v0  ;;  %76 = vst.msk [vmem:[#allocation4 + $0x18] sm:$0xff] %vm72_vm0, %v1102_v0  ;;  %932 = vmatprep.subr.mxu1 %v1102_v0  ;;  %934 = vmatprep.mubr.msk.f32.mxu1 %vm1103_vm1, %v1102_v0  ;;  %v81_v4 = vmul.f32 0.17677669, %v77_v2  ;;  %v78_v5 = vld [vmem:[#allocation5 + $0x8] sm:$0xff]  ;;  %v79_v6 = vld [vmem:[#allocation5 + $0x10] sm:$0xff] }
  0x39   :  { %928 = vmatpush3.xpose.msk.msra.mxu0 %vm72_vm0, %v85_v1  ;;  %933 = vmatpush3.xpose.msk.msra.mxu1 %vm72_vm0, %v86_v3  ;;  %v82_v7 = vmul.f32 0.17677669, %v78_v5  ;;  %v87_v8 = vld [vmem:[#allocation8 + $0x10] sm:$0xff]  ;;  %v80_v9 = vld [vmem:[#allocation5 + $0x18] sm:$0xff]  ;;  %v83_v11 = vmul.f32 0.17677669, %v79_v6 }
  0x3a   :  { %937 = vmatprep.subr.mxu0 %v1102_v0  ;;  %942 = vmatprep.subr.mxu1 %v1102_v0  ;;  %v88_v10 = vld [vmem:[#allocation8 + $0x18] sm:$0xff]  ;;  %v84_v12 = vmul.f32 0.17677669, %v80_v9  ;;  %64 = vst.msk [vmem:[#allocation2] sm:$0xff] %vm63_vm2, %v1104_v13  ;;  %65 = vst.msk [vmem:[#allocation2 + $0x8] sm:$0xff] %vm63_vm2, %v1104_v13  ;;  %v93_v14 = vld [vmem:[%s1301_s3] sm:$0xff] }
  0x3b   :  { %66 = vst.msk [vmem:[#allocation2 + $0x10] sm:$0xff] %vm63_vm2, %v1104_v13  ;;  %67 = vst.msk [vmem:[#allocation2 + $0x18] sm:$0xff] %vm63_vm2, %v1104_v13  ;;  %v94_v15 = vmul.f32 -10000.0, %v93_v14  ;;  %vm404_vm3 = vcmask 64512   ;;  %v1105_v32 = vmov 0   ;;  %v89_v49 = vld [vmem:[#allocation10] sm:$0xff] }
  0x3c   :  { %930 = vmatmul.mubr.msk.f32.vlgmr.msra.gmra.mrb[0].mxu0 %vm72_vm0, %v81_v4  ;;  %935 = vmatmul.mubr.msk.f32.vlgmr.msra.gmra.mrb[0].mxu1 %vm72_vm0, %v82_v7  ;;  %68 = vst.msk [vmem:[#allocation3] sm:$0xff] %vm63_vm2, %v1102_v0  ;;  %69 = vst.msk [vmem:[#allocation3 + $0x8] sm:$0xff] %vm63_vm2, %v1102_v0  ;;  %v90_v50 = vld [vmem:[#allocation10 + $0x8] sm:$0xff]  ;;  %v91_v62 = vld [vmem:[#allocation10 + $0x10] sm:$0xff]  ;;  %s1106_s3 = smov [#allocation11]  }
  0x3d   :  { %938 = vmatpush3.xpose.msk.msra.mxu0 %vm72_vm0, %v87_v8  ;;  %939 = vmatprep.mubr.msk.f32.mxu0 %vm1103_vm1, %v1102_v0  ;;  %70 = vst.msk [vmem:[#allocation3 + $0x10] sm:$0xff] %vm63_vm2, %v1102_v0  ;;  %71 = vst.msk [vmem:[#allocation3 + $0x18] sm:$0xff] %vm63_vm2, %v1102_v0  ;;  %v92_v3 = vld [vmem:[#allocation10 + $0x18] sm:$0xff]  ;;  %s886_s26 = sshll.u32 %s1106_s3, 4  ;;  %s887_s26 = int_to_ptr.vmem [resolvable:$true] %s886_s26 }
  0x3e   :  { %943 = vmatpush3.xpose.msk.msra.mxu1 %vm72_vm0, %v88_v10  ;;  %944 = vmatprep.mubr.msk.f32.mxu1 %vm1103_vm1, %v1102_v0  ;;  %s1069_s29 = scalar_lea.vmem %s887_s26, 512  ;;  %p1074_p11 = scmp.lt.s32.totalorder %s887_s26, %s887_s26 }
  0x3f   :  { %947 = vmatprep.subr.mxu0 %v1102_v0  ;;  %952 = vmatprep.subr.mxu1 %v1102_v0  ;;  %p1070_p10 = scmp.ne.s32.totalorder %s887_s26, %s1069_s29  ;;  %p1075_p12 = scmp.lt.s32.totalorder %s1069_s29, %s1069_s29 }
  0x40   :  { %940 = vmatmul.mubr.msk.f32.vlgmr.msra.gmra.mrb[2].mxu0 %vm72_vm0, %v83_v11  ;;  %977 = vset.pattern.permute.xlu0 %v1105_v32 }
  0x41   :  { %945 = vmatmul.mubr.msk.f32.vlgmr.msra.gmra.mrb[2].mxu1 %vm72_vm0, %v84_v12  ;;  %949 = vmatprep.mubr.msk.f32.mxu0 %vm1103_vm1, %v1102_v0  ;;  %v1237_v33 = vld [vmem:[#allocation2] sm:$0xff]  ;;  %v401_v36 = vld [vmem:[#allocation2 + $0x8] sm:$0xff]  ;;  %p1076_p13 = por %p1075_p12, %p1074_p11 }
  0x42   :  { %954 = vmatprep.mubr.msk.f32.mxu1 %vm1103_vm1, %v1102_v0  ;;  %978 = vset.pattern.permute.xlu1 %v1105_v32  ;;  %v1242_v37 = vld [vmem:[#allocation2 + $0x10] sm:$0xff]  ;;  %v403_v43 = vld [vmem:[#allocation2 + $0x18] sm:$0xff] }
  0x43   :  { %948 = vmatpush3.msra.mxu0 %v89_v49  ;;  %953 = vmatpush3.msra.mxu1 %v90_v50  ;;  %p1077_p0 = pnand %p1076_p13, %p1070_p10 }
  0x44   :  { %957 = vmatprep.subr.mxu0 %v1102_v0  ;;  %962 = vmatprep.subr.mxu1 %v1102_v0 }
 0x10f   :  { %v168_v16 = vpop.f32.mrb[0].mxu0  ;;  %v244_v17 = vpop.f32.mrb[0].mxu1 }
 0x110   :  { %v169_v18 = vadd.f32 %v168_v16, %v94_v15  ;;  %v931_v19 = vpop.f32.mrb[1].mxu0  ;;  %v245_v20 = vadd.f32 %v244_v17, %v94_v15  ;;  %v936_v21 = vpop.f32.mrb[1].mxu1  ;;  %v465_v17 = vld [vmem:[#allocation3] sm:$0xff] }
 0x112   :  { %v405_v22 = vsel %vm404_vm3, %v169_v18, -inf  ;;  %v408_v25 = vsel %vm404_vm3, %v245_v20, -inf }
 0x113   :  { %406 = vmax.xlane.f32.xlu0 %v405_v22  ;;  %v320_v23 = vpop.f32.mrb[2].mxu0 }
 0x114   :  { %v321_v24 = vadd.f32 %v320_v23, %v94_v15  ;;  %v941_v26 = vpop.f32.mrb[3].mxu0  ;;  %v396_v27 = vpop.f32.mrb[2].mxu1 }
 0x115   :  { %v397_v28 = vadd.f32 %v396_v27, %v94_v15  ;;  %v946_v29 = vpop.f32.mrb[3].mxu1 }
 0x116   :  { %v411_v30 = vsel %vm404_vm3, %v321_v24, -inf }
 0x117   :  { %409 = vmax.xlane.f32.xlu0 %v408_v25  ;;  %412 = vmax.xlane.f32.xlu1 %v411_v30  ;;  %v414_v31 = vsel %vm404_vm3, %v397_v28, -inf }
 0x11b   :  { %415 = vmax.xlane.f32.xlu1 %v414_v31 }
 0x1a0   :  { %v407_v34 = vpop.xlane.xlu0 %406 }
 0x1a1   :  { %v1240_v35 = vmax.f32 %v1237_v33, %v407_v34 }
 0x1a3   :  { %v421_v38 = vsub.f32 %v1237_v33, %v1240_v35  ;;  %822 = vst.msk [vmem:[#allocation2] sm:$0xff] %vm63_vm2, %v1240_v35  ;;  %435 = vperm.xlu0 %977, %v1240_v35  }
 0x1a4   :  { %v410_v39 = vpop.xlane.xlu0 %409  ;;  %v413_v40 = vpop.xlane.xlu1 %412 }
 0x1a5   :  { %v418_v41 = vmax.f32 %v401_v36, %v410_v39  ;;  %v419_v42 = vmax.f32 %v1242_v37, %v413_v40  ;;  %v425_v11 = vmul.f32 1.442695, %v421_v38 }
 0x1a7   :  { %v422_v44 = vsub.f32 %v401_v36, %v418_v41  ;;  %823 = vst.msk [vmem:[#allocation2 + $0x8] sm:$0xff] %vm63_vm2, %v418_v41  ;;  %440 = vperm.xlu1 %978, %v418_v41   ;;  %v423_v45 = vsub.f32 %v1242_v37, %v419_v42  ;;  %824 = vst.msk [vmem:[#allocation2 + $0x10] sm:$0xff] %vm63_vm2, %v419_v42 }
 0x1a8   :  { %v416_v46 = vpop.xlane.xlu1 %415 }
 0x1a9   :  { %v420_v47 = vmax.f32 %v403_v43, %v416_v46  ;;  %v427_v9 = vmul.f32 1.442695, %v422_v44 }
 0x1ab   :  { %445 = vperm.xlu1 %978, %v419_v42   ;;  %v424_v48 = vsub.f32 %v403_v43, %v420_v47  ;;  %825 = vst.msk [vmem:[#allocation2 + $0x18] sm:$0xff] %vm63_vm2, %v420_v47 }
 0x1ad   :  { %v431_v12 = vmul.f32 1.442695, %v424_v48 }
 0x1af   :  { %450 = vperm.xlu1 %978, %v420_v47  }
 0x222   :  { %v436_v51 = vpop.permute.xlu0 %435 }
 0x223   :  { %v453_v52 = vsub.f32 %v169_v18, %v436_v51 }
 0x225   :  { %v457_v53 = vmul.f32 1.442695, %v453_v52 }
 0x226   :  { %v441_v54 = vpop.permute.xlu1 %440 }
 0x227   :  { %979 = vpow2.f32 %v457_v53  ;;  %v454_v55 = vsub.f32 %v245_v20, %v441_v54  ;;  %v466_v20 = vld [vmem:[#allocation3 + $0x8] sm:$0xff]  ;;  %v494_v53 = vld [vmem:[#allocation4] sm:$0xff] }
 0x229   :  { %v459_v56 = vmul.f32 1.442695, %v454_v55 }
 0x22a   :  { %v446_v57 = vpop.permute.xlu1 %445 }
 0x22b   :  { %981 = vpow2.f32 %v459_v56  ;;  %v455_v58 = vsub.f32 %v321_v24, %v446_v57  ;;  %v467_v24 = vld [vmem:[#allocation3 + $0x10] sm:$0xff]  ;;  %v495_v56 = vld [vmem:[#allocation4 + $0x8] sm:$0xff] }
 0x22d   :  { %v461_v59 = vmul.f32 1.442695, %v455_v58 }
 0x22e   :  { %v451_v60 = vpop.permute.xlu1 %450 }
 0x22f   :  { %983 = vpow2.f32 %v461_v59  ;;  %v456_v61 = vsub.f32 %v397_v28, %v451_v60  ;;  %v468_v28 = vld [vmem:[#allocation3 + $0x18] sm:$0xff] }
 0x231   :  { %v980_v63 = vpop.eup %979  ;;  %v463_v1 = vmul.f32 1.442695, %v456_v61 }
 0x232   :  { %950 = vmatmul.mubr.msk.f32.vlgmr.msra.gmra.mrb[4].mxu0 %vm404_vm3, %v980_v63  ;;  %v473_v2 = vsel %vm404_vm3, %v980_v63, 0.0  ;;  %v496_v63 = vld [vmem:[#allocation4 + $0x10] sm:$0xff] }
 0x233   :  { %985 = vpow2.f32 %v463_v1  ;;  %474 = vadd.xlane.f32.xlu1 %v473_v2  ;;  %958 = vmatpush3.msra.mxu0 %v91_v62 }
 0x234   :  { %959 = vmatprep.mubr.msk.f32.mxu0 %vm1103_vm1, %v1102_v0  ;;  %987 = vpow2.f32 %v427_v9 }
 0x235   :  { %v982_v4 = vpop.eup %981  ;;  %989 = vpow2.f32 %v425_v11 }
 0x236   :  { %955 = vmatmul.mubr.msk.f32.vlgmr.msra.gmra.mrb[4].mxu1 %vm404_vm3, %v982_v4  ;;  %v476_v5 = vsel %vm404_vm3, %v982_v4, 0.0 }
 0x237   :  { %477 = vadd.xlane.f32.xlu0 %v476_v5  ;;  %963 = vmatpush3.msra.mxu1 %v92_v3  ;;  %v497_v5 = vld [vmem:[#allocation4 + $0x18] sm:$0xff] }
 0x238   :  { %964 = vmatprep.mubr.msk.f32.mxu1 %vm1103_vm1, %v1102_v0  ;;  %v429_v0 = vmul.f32 1.442695, %v423_v45 }
 0x239   :  { %v984_v6 = vpop.eup %983 }
 0x23a   :  { %960 = vmatmul.mubr.msk.f32.vlgmr.msra.gmra.mrb[6].mxu0 %vm404_vm3, %v984_v6  ;;  %v479_v7 = vsel %vm404_vm3, %v984_v6, 0.0  ;;  %991 = vpow2.f32 %v429_v0 }
 0x23b   :  { %480 = vadd.xlane.f32.xlu1 %v479_v7  ;;  %993 = vpow2.f32 %v431_v12 }
 0x23d   :  { %v986_v8 = vpop.eup %985 }
 0x23e   :  { %965 = vmatmul.mubr.msk.f32.vlgmr.msra.gmra.mrb[6].mxu1 %vm404_vm3, %v986_v8  ;;  %v482_v10 = vsel %vm404_vm3, %v986_v8, 0.0  ;;  %v988_v13 = vpop.eup %987 }
 0x23f   :  { %483 = vadd.xlane.f32.xlu1 %v482_v10  ;;  %v990_v14 = vpop.eup %989  ;;  %v470_v22 = vmul.f32 %v988_v13, %v466_v20 }
 0x240   :  { %v469_v18 = vmul.f32 %v990_v14, %v465_v17 }
 0x244   :  { %v992_v15 = vpop.eup %991 }
 0x245   :  { %v994_v16 = vpop.eup %993  ;;  %v471_v26 = vmul.f32 %v992_v15, %v467_v24 }
 0x246   :  { %v472_v31 = vmul.f32 %v994_v16, %v468_v28 }
 0x24d   :  { %505 = vperm.xlu0 %977, %v988_v13  }
 0x250   :  { %500 = vperm.xlu1 %978, %v990_v14  }
 0x254   :  { %510 = vperm.xlu1 %978, %v992_v15  }
 0x258   :  { %515 = vperm.xlu1 %978, %v994_v16  }
 0x2c0   :  { %v475_v19 = vpop.xlane.xlu1 %474 }
 0x2c1   :  { %v485_v21 = vadd.f32 %v475_v19, %v469_v18 }
 0x2c3   :  { %490 = vst.msk [vmem:[#allocation3] sm:$0xff] %vm63_vm2, %v485_v21 }
 0x2c4   :  { %v478_v23 = vpop.xlane.xlu0 %477 }
 0x2c5   :  { %v486_v25 = vadd.f32 %v478_v23, %v470_v22 }
 0x2c7   :  { %491 = vst.msk [vmem:[#allocation3 + $0x8] sm:$0xff] %vm63_vm2, %v486_v25 }
 0x2c8   :  { %v481_v27 = vpop.xlane.xlu1 %480 }
 0x2c9   :  { %v487_v29 = vadd.f32 %v481_v27, %v471_v26 }
 0x2ca   :  { %v829_v30 = vld [vmem:[#allocation3] sm:$0xff] }
 0x2cb   :  { %492 = vst.msk [vmem:[#allocation3 + $0x10] sm:$0xff] %vm63_vm2, %v487_v29  ;;  %995 = vrcp.f32 %v829_v30 }
 0x2cc   :  { %v484_v32 = vpop.xlane.xlu1 %483  ;;  %v506_v57 = vpop.permute.xlu0 %505 }
 0x2cd   :  { %v488_v33 = vadd.f32 %v484_v32, %v472_v31  ;;  %v519_v62 = vmul.f32 %v506_v57, %v495_v56 }
 0x2ce   :  { %v830_v34 = vld [vmem:[#allocation3 + $0x8] sm:$0xff] }
 0x2cf   :  { %493 = vst.msk [vmem:[#allocation3 + $0x18] sm:$0xff] %vm63_vm2, %v488_v33  ;;  %997 = vrcp.f32 %v830_v34 }
 0x2d0   :  { %v501_v54 = vpop.permute.xlu1 %500 }
 0x2d1   :  { %v518_v55 = vmul.f32 %v501_v54, %v494_v53 }
 0x2d2   :  { %v831_v35 = vld [vmem:[#allocation3 + $0x10] sm:$0xff] }
 0x2d3   :  { %999 = vrcp.f32 %v831_v35 }
 0x2d4   :  { %v511_v61 = vpop.permute.xlu1 %510 }
 0x2d5   :  { %v996_v36 = vpop.eup %995  ;;  %v520_v4 = vmul.f32 %v511_v61, %v496_v63 }
 0x2d6   :  { %v837_v37 = vmul.f32 %v996_v36, %v829_v30  ;;  %v832_v38 = vld [vmem:[#allocation3 + $0x18] sm:$0xff] }
 0x2d7   :  { %1001 = vrcp.f32 %v832_v38 }
 0x2d8   :  { %v841_v39 = vsub.f32 2.0, %v837_v37  ;;  %v516_v6 = vpop.permute.xlu1 %515 }
 0x2d9   :  { %v998_v40 = vpop.eup %997  ;;  %v521_v10 = vmul.f32 %v516_v6, %v497_v5 }
 0x2da   :  { %v845_v41 = vmul.f32 %v996_v36, %v841_v39  ;;  %v838_v42 = vmul.f32 %v998_v40, %v830_v34 }
 0x2dc   :  { %855 = vperm.xlu1 %978, %v845_v41   ;;  %v842_v43 = vsub.f32 2.0, %v838_v42 }
 0x2dd   :  { %v1000_v44 = vpop.eup %999 }
 0x2de   :  { %v846_v45 = vmul.f32 %v998_v40, %v842_v43  ;;  %v839_v46 = vmul.f32 %v1000_v44, %v831_v35 }
 0x2e0   :  { %860 = vperm.xlu0 %977, %v846_v45   ;;  %v843_v47 = vsub.f32 2.0, %v839_v46 }
 0x2e1   :  { %v1002_v48 = vpop.eup %1001 }
 0x2e2   :  { %v847_v49 = vmul.f32 %v1000_v44, %v843_v47  ;;  %v840_v50 = vmul.f32 %v1002_v48, %v832_v38 }
 0x2e4   :  { %865 = vperm.xlu1 %978, %v847_v49   ;;  %v844_v51 = vsub.f32 2.0, %v840_v50 }
 0x2e6   :  { %v848_v52 = vmul.f32 %v1002_v48, %v844_v51 }
 0x2e8   :  { %870 = vperm.xlu0 %977, %v848_v52  }
 0x305   :  { %v591_v58 = vpop.f32.mrb[4].mxu0 }
 0x306   :  { %v814_v59 = vadd.f32 %v591_v58, %v518_v55  ;;  %v951_v60 = vpop.f32.mrb[5].mxu0 }
 0x308   :  { %818 = vst.msk [vmem:[#allocation4] sm:$0xff] %vm72_vm0, %v814_v59 }
 0x309   :  { %v664_v1 = vpop.f32.mrb[4].mxu1 }
 0x30a   :  { %v815_v2 = vadd.f32 %v664_v1, %v519_v62  ;;  %v956_v3 = vpop.f32.mrb[5].mxu1 }
 0x30c   :  { %819 = vst.msk [vmem:[#allocation4 + $0x8] sm:$0xff] %vm72_vm0, %v815_v2 }
 0x30d   :  { %v737_v7 = vpop.f32.mrb[6].mxu0 }
 0x30e   :  { %v816_v8 = vadd.f32 %v737_v7, %v520_v4  ;;  %v961_v9 = vpop.f32.mrb[7].mxu0 }
 0x30f   :  { %v849_v13 = vld [vmem:[#allocation4] sm:$0xff] }
 0x310   :  { %820 = vst.msk [vmem:[#allocation4 + $0x10] sm:$0xff] %vm72_vm0, %v816_v8 }
 0x311   :  { %v810_v11 = vpop.f32.mrb[6].mxu1 }
 0x312   :  { %v817_v0 = vadd.f32 %v810_v11, %v521_v10  ;;  %v966_v12 = vpop.f32.mrb[7].mxu1 }
 0x313   :  { %v850_v16 = vld [vmem:[#allocation4 + $0x8] sm:$0xff] }
 0x314   :  { %821 = vst.msk [vmem:[#allocation4 + $0x18] sm:$0xff] %vm72_vm0, %v817_v0 }
 0x317   :  { %v851_v19 = vld [vmem:[#allocation4 + $0x10] sm:$0xff] }
 0x31b   :  { %v852_v23 = vld [vmem:[#allocation4 + $0x18] sm:$0xff] }
 0x35b   :  { %v856_v14 = vpop.permute.xlu1 %855 }
 0x35c   :  { %v873_v15 = vmul.f32 %v856_v14, %v849_v13 }
 0x35e   :  { %877 = vst.msk [vmem:[#allocation11] sm:$0xff] %vm72_vm0, %v873_v15 }
 0x35f   :  { %v861_v17 = vpop.permute.xlu0 %860 }
 0x360   :  { %v874_v18 = vmul.f32 %v861_v17, %v850_v16 }
 0x362   :  { %878 = vst.msk [vmem:[#allocation11 + $0x8] sm:$0xff] %vm72_vm0, %v874_v18 }
 0x363   :  { %v866_v20 = vpop.permute.xlu1 %865 }
 0x364   :  { %v875_v21 = vmul.f32 %v866_v20, %v851_v19 }
 0x366   :  { %879 = vst.msk [vmem:[#allocation11 + $0x10] sm:$0xff] %vm72_vm0, %v875_v21 }
 0x367   :  { %v871_v22 = vpop.permute.xlu0 %870 }
 0x368   :  { %v876_v24 = vmul.f32 %v871_v22, %v852_v23 }
 0x36a   :  { %880 = vst.msk [vmem:[#allocation11 + $0x18] sm:$0xff] %vm72_vm0, %v876_v24 }
 0x36b   :  { %1080 = shalt.err (!%p1077_p0)
}
 0x36c   :  { %s1081_s6 = scalar_lea.hbm %s1302_s4, 512 }
 0x36d   :  { %p1082_p1 = scmp.ne.s32.totalorder %s1302_s4, %s1081_s6  ;;  %p1085_p2 = scmp.lt.u32.totalorder %s1081_s6, %s1302_s4 }
 0x36f   :  { %p1087_p3 = pnand %p1085_p2, %p1082_p1 }
 0x371   :  { %1090 = shalt.err (!%p1087_p3)
}
 0x372   :  { %892 = dma.vmem_to_hbm [thread:$0]  %s887_s26, 512, %s1302_s4, [#allocation7], %s1099_s27, %s1099_s27, %s1100_s28  }
 0x373   :  { %1095 = dma.done.wait [#allocation7], 512  }
 0x374   :  { %1096 = vsyncadd [#allocation7], 4294966784 }
 0x375   :  { %896 = vsyncpa [#allocation6], 1 }
 0x376   :  { %897 = vsyncpa [#allocation9], 1 }
 0x377   :  { %898 = vsyncpa [#allocation7], 1 }

</bundles_post_ra>
